<compile_context>
chip_gen: v5e
topology: v5e:2x2
jax: 0.10.0
libtpu: 0.0.40
codegen_flags: <defaults>
</compile_context>

<pallas_src>
import functools

import jax
import jax.numpy as jnp
from jax.experimental import pallas as pl
from jax.experimental.pallas import tpu as pltpu


LANE = 128      # pad every feature dim to a multiple of the 128-lane vreg width
SUBLANE = 16    # bf16 sublane packing -> batch tiles are multiples of 16


def _round_up(x, m):
    return ((x + m - 1) // m) * m


def _relu_flags(layer_structure):
    """Mirror the PyTorch __init__ logic: which Linear layers are followed by ReLU."""
    n = len(layer_structure)
    bottleneck = int(n / 2)
    return tuple(
        (index < n - 2) and ((index + 1) != bottleneck)
        for index in range(n - 1)
    )


def make_autoencoder_kernel(relu_flags):
    """Build a Pallas kernel computing the whole Linear/ReLU chain in VMEM."""
    n_layers = len(relu_flags)

    def kernel(*refs):
        # refs = (x_ref, w0, b0, w1, b1, ..., out_ref)
        x_ref = refs[0]
        out_ref = refs[-1]
        param_refs = refs[1:-1]

        h = x_ref[...]                        # (TILE_B, D0_pad) bf16
        for li in range(n_layers):
            w = param_refs[2 * li][...]       # (in_pad, out_pad) bf16, VMEM-resident
            b = param_refs[2 * li + 1][...]   # (1, out_pad) f32
            # bf16 MXU matmul with f32 accumulation; bias-add / ReLU in f32.
            acc = jnp.dot(h, w, preferred_element_type=jnp.float32) + b
            if relu_flags[li]:
                acc = jnp.maximum(acc, 0.0)
            # Feed the next MXU pass as bf16; keep the last layer in f32.
            h = acc.astype(jnp.bfloat16) if li < n_layers - 1 else acc
        out_ref[...] = h.astype(out_ref.dtype)

    return kernel


def init_params(key, layer_structure):
    """Deterministic Linear params, PyTorch-style shapes: W (out, in), b (out,)."""
    params = []
    for i in range(len(layer_structure) - 1):
        fan_in = layer_structure[i]
        fan_out = layer_structure[i + 1]
        key, kw, kb = jax.random.split(key, 3)
        bound = 1.0 / jnp.sqrt(jnp.float32(fan_in))
        w = jax.random.uniform(kw, (fan_out, fan_in), jnp.float32, -bound, bound)
        b = jax.random.uniform(kb, (fan_out,), jnp.float32, -bound, bound)
        params.append((w, b))
    return params


def prepare_params(params, layer_structure):
    """One-time glue (hoisted out of the forward): pad feature dims to 128 lanes,
    transpose W to (in, out), cast weights to bf16; biases stay f32 as (1, out_pad)."""
    prepared = []
    for i, (w, b) in enumerate(params):
        fan_in = layer_structure[i]
        fan_out = layer_structure[i + 1]
        in_pad = _round_up(fan_in, LANE)
        out_pad = _round_up(fan_out, LANE)
        wt = jnp.zeros((in_pad, out_pad), jnp.float32)
        wt = wt.at[:fan_in, :fan_out].set(jnp.asarray(w, jnp.float32).T)
        bp = jnp.zeros((1, out_pad), jnp.float32)
        bp = bp.at[0, :fan_out].set(jnp.asarray(b, jnp.float32))
        prepared.append((wt.astype(jnp.bfloat16), bp))
    return prepared


@functools.partial(jax.jit, static_argnames=("layer_structure", "tile_b"))
def autoencoder_forward(x, prepared_params, *, layer_structure, tile_b=512):
    """Full autoencoder forward in one batch-tiled Pallas kernel invocation."""
    relu_flags = _relu_flags(layer_structure)
    kernel = make_autoencoder_kernel(relu_flags)

    B, d_in = x.shape
    d_out = layer_structure[-1]
    d_in_pad = _round_up(layer_structure[0], LANE)
    d_out_pad = _round_up(d_out, LANE)

    # Batch tile: multiple of 16 sublanes, no larger than the (padded) batch.
    tile_b = min(_round_up(int(tile_b), SUBLANE), _round_up(B, SUBLANE))
    b_pad = _round_up(B, tile_b)

    # Pad + cast the input once: (B_pad, D0_pad) bf16 (zero padding is inert:
    # padded W rows/cols and biases are zero, so padded lanes stay zero).
    x_p = jnp.zeros((b_pad, d_in_pad), jnp.bfloat16)
    x_p = x_p.at[:B, :d_in].set(x.astype(jnp.bfloat16))

    flat_args = [x_p]
    in_specs = [pl.BlockSpec((tile_b, d_in_pad), lambda i: (i, 0))]
    for (wt, bp) in prepared_params:
        flat_args.append(wt)
        in_specs.append(pl.BlockSpec(wt.shape, lambda i: (0, 0)))   # resident weights
        flat_args.append(bp)
        in_specs.append(pl.BlockSpec(bp.shape, lambda i: (0, 0)))   # resident biases
    out_specs = pl.BlockSpec((tile_b, d_out_pad), lambda i: (i, 0))
    grid = (b_pad // tile_b,)

    # VMEM budget: resident params (single-buffered) + double-buffered x/out
    # tiles + f32 activation temporaries, with 2x headroom; capped at 64 MiB so
    # the same budget is valid on v7x (64 MiB physical) and v5e/v6e.
    weight_bytes = sum(wt.size * wt.dtype.itemsize + bp.size * 4
                       for (wt, bp) in prepared_params)
    max_feat_pad = max(_round_up(d, LANE) for d in layer_structure)
    stream_bytes = 2 * (tile_b * d_in_pad * 2 + tile_b * d_out_pad * 4)
    act_bytes = 2 * tile_b * max_feat_pad * 4
    vmem_limit = int(min(max(2 * (weight_bytes + stream_bytes + act_bytes),
                             32 * 1024 * 1024),
                         64 * 1024 * 1024))

    flops = 2 * b_pad * sum(
        _round_up(layer_structure[i], LANE) * _round_up(layer_structure[i + 1], LANE)
        for i in range(len(layer_structure) - 1))
    bytes_accessed = x_p.size * 2 + weight_bytes + b_pad * d_out_pad * 4

    out_p = pl.pallas_call(
        kernel,
        out_shape=jax.ShapeDtypeStruct((b_pad, d_out_pad), jnp.float32),
        grid=grid,
        in_specs=in_specs,
        out_specs=out_specs,
        compiler_params=pltpu.CompilerParams(
            dimension_semantics=("parallel",),
            vmem_limit_bytes=vmem_limit,
        ),
        cost_estimate=pl.CostEstimate(
            flops=flops, transcendentals=0, bytes_accessed=bytes_accessed),
    )(*flat_args)

    return out_p[:B, :d_out]


def autoencoder_ref(x, params, layer_structure):
    """Pure-JAX reference mirroring the PyTorch forward, with matching bf16
    inputs / f32 accumulation so it is a tight regression oracle."""
    relu_flags = _relu_flags(layer_structure)
    n = len(params)
    h = x.astype(jnp.bfloat16)
    for li, ((w, b), act) in enumerate(zip(params, relu_flags)):
        acc = jnp.dot(h, jnp.asarray(w, jnp.float32).astype(jnp.bfloat16).T,
                      preferred_element_type=jnp.float32) + b
        if act:
            acc = jnp.maximum(acc, 0.0)
        h = acc.astype(jnp.bfloat16) if li < n - 1 else acc
    return h


if __name__ == "__main__":
    # Small autoencoder: 32 -> 16 -> 8 (bottleneck) -> 16 -> 32
    layer_structure = (32, 16, 8, 16, 32)
    B = 8

    key = jax.random.PRNGKey(0)
    key, kx = jax.random.split(key)
    x = jax.random.normal(kx, (B, layer_structure[0]), jnp.float32)
    params = init_params(key, layer_structure)
    prepared = prepare_params(params, layer_structure)   # one-time param prep

    out = autoencoder_forward(x, prepared, layer_structure=layer_structure, tile_b=512)
    out = jax.block_until_ready(out)

    ref = autoencoder_ref(x, params, layer_structure)
    assert out.shape == (B, layer_structure[-1])
    assert jnp.allclose(out, ref, atol=1e-2, rtol=1e-2), "mismatch vs reference"

    print("KERNEL_OK")
</pallas_src>

<mosaic_0001>
module attributes {stable_mosaic.version = 11 : i64} {
  func.func @kernel(%arg0: i32, %arg1: memref<16x128xbf16, #tpu.memory_space<vmem>>, %arg2: memref<128x128xbf16, #tpu.memory_space<vmem>>, %arg3: memref<1x128xf32, #tpu.memory_space<vmem>>, %arg4: memref<128x128xbf16, #tpu.memory_space<vmem>>, %arg5: memref<1x128xf32, #tpu.memory_space<vmem>>, %arg6: memref<128x128xbf16, #tpu.memory_space<vmem>>, %arg7: memref<1x128xf32, #tpu.memory_space<vmem>>, %arg8: memref<128x128xbf16, #tpu.memory_space<vmem>>, %arg9: memref<1x128xf32, #tpu.memory_space<vmem>>, %arg10: memref<16x128xf32, #tpu.memory_space<vmem>>) attributes {dimension_semantics = [#tpu.dimension_semantics<parallel>], iteration_bounds = array<i64: 1>, scalar_prefetch = 0 : i64, scratch_operands = 0 : i64, tpu.core_type = #tpu.core_type<tc>, window_params = [{transform_indices = @transform_0, window_bounds = array<i64: 16, 128>}, {pipeline_mode = #tpu.pipeline_mode<synchronous>, transform_indices = @transform_1, window_bounds = array<i64: 128, 128>}, {pipeline_mode = #tpu.pipeline_mode<synchronous>, transform_indices = @transform_2, window_bounds = array<i64: 1, 128>}, {pipeline_mode = #tpu.pipeline_mode<synchronous>, transform_indices = @transform_3, window_bounds = array<i64: 128, 128>}, {pipeline_mode = #tpu.pipeline_mode<synchronous>, transform_indices = @transform_4, window_bounds = array<i64: 1, 128>}, {pipeline_mode = #tpu.pipeline_mode<synchronous>, transform_indices = @transform_5, window_bounds = array<i64: 128, 128>}, {pipeline_mode = #tpu.pipeline_mode<synchronous>, transform_indices = @transform_6, window_bounds = array<i64: 1, 128>}, {pipeline_mode = #tpu.pipeline_mode<synchronous>, transform_indices = @transform_7, window_bounds = array<i64: 128, 128>}, {pipeline_mode = #tpu.pipeline_mode<synchronous>, transform_indices = @transform_8, window_bounds = array<i64: 1, 128>}, {transform_indices = @transform_9, window_bounds = array<i64: 16, 128>}]} {
    %c0 = arith.constant 0 : index
    %c0_0 = arith.constant 0 : index
    %0 = vector.load %arg1[%c0, %c0_0] : memref<16x128xbf16, #tpu.memory_space<vmem>>, vector<16x128xbf16>
    %c0_1 = arith.constant 0 : index
    %c0_2 = arith.constant 0 : index
    %1 = vector.load %arg2[%c0_1, %c0_2] : memref<128x128xbf16, #tpu.memory_space<vmem>>, vector<128x128xbf16>
    %c0_3 = arith.constant 0 : index
    %c0_4 = arith.constant 0 : index
    %2 = vector.load %arg3[%c0_3, %c0_4] : memref<1x128xf32, #tpu.memory_space<vmem>>, vector<1x128xf32>
    %cst = arith.constant dense<0.000000e+00> : vector<16x128xf32>
    %3 = tpu.matmul %0, %1, %cst {dimension_numbers = #tpu.dot_dimension_numbers<[1], [0], [0], [1], [0, 0, 1, 1], [], []>} : vector<16x128xbf16>, vector<128x128xbf16>, vector<16x128xf32> -> vector<16x128xf32>
    %4 = vector.broadcast %2 : vector<1x128xf32> to vector<16x128xf32>
    %5 = arith.addf %3, %4 : vector<16x128xf32>
    %cst_5 = arith.constant 0.000000e+00 : f32
    %6 = vector.broadcast %cst_5 : f32 to vector<16x128xf32>
    %7 = arith.maximumf %5, %6 : vector<16x128xf32>
    %8 = arith.truncf %7 : vector<16x128xf32> to vector<16x128xbf16>
    %c0_6 = arith.constant 0 : index
    %c0_7 = arith.constant 0 : index
    %9 = vector.load %arg4[%c0_6, %c0_7] : memref<128x128xbf16, #tpu.memory_space<vmem>>, vector<128x128xbf16>
    %c0_8 = arith.constant 0 : index
    %c0_9 = arith.constant 0 : index
    %10 = vector.load %arg5[%c0_8, %c0_9] : memref<1x128xf32, #tpu.memory_space<vmem>>, vector<1x128xf32>
    %cst_10 = arith.constant dense<0.000000e+00> : vector<16x128xf32>
    %11 = tpu.matmul %8, %9, %cst_10 {dimension_numbers = #tpu.dot_dimension_numbers<[1], [0], [0], [1], [0, 0, 1, 1], [], []>} : vector<16x128xbf16>, vector<128x128xbf16>, vector<16x128xf32> -> vector<16x128xf32>
    %12 = vector.broadcast %10 : vector<1x128xf32> to vector<16x128xf32>
    %13 = arith.addf %11, %12 : vector<16x128xf32>
    %14 = arith.truncf %13 : vector<16x128xf32> to vector<16x128xbf16>
    %c0_11 = arith.constant 0 : index
    %c0_12 = arith.constant 0 : index
    %15 = vector.load %arg6[%c0_11, %c0_12] : memref<128x128xbf16, #tpu.memory_space<vmem>>, vector<128x128xbf16>
    %c0_13 = arith.constant 0 : index
    %c0_14 = arith.constant 0 : index
    %16 = vector.load %arg7[%c0_13, %c0_14] : memref<1x128xf32, #tpu.memory_space<vmem>>, vector<1x128xf32>
    %cst_15 = arith.constant dense<0.000000e+00> : vector<16x128xf32>
    %17 = tpu.matmul %14, %15, %cst_15 {dimension_numbers = #tpu.dot_dimension_numbers<[1], [0], [0], [1], [0, 0, 1, 1], [], []>} : vector<16x128xbf16>, vector<128x128xbf16>, vector<16x128xf32> -> vector<16x128xf32>
    %18 = vector.broadcast %16 : vector<1x128xf32> to vector<16x128xf32>
    %19 = arith.addf %17, %18 : vector<16x128xf32>
    %cst_16 = arith.constant 0.000000e+00 : f32
    %20 = vector.broadcast %cst_16 : f32 to vector<16x128xf32>
    %21 = arith.maximumf %19, %20 : vector<16x128xf32>
    %22 = arith.truncf %21 : vector<16x128xf32> to vector<16x128xbf16>
    %c0_17 = arith.constant 0 : index
    %c0_18 = arith.constant 0 : index
    %23 = vector.load %arg8[%c0_17, %c0_18] : memref<128x128xbf16, #tpu.memory_space<vmem>>, vector<128x128xbf16>
    %c0_19 = arith.constant 0 : index
    %c0_20 = arith.constant 0 : index
    %24 = vector.load %arg9[%c0_19, %c0_20] : memref<1x128xf32, #tpu.memory_space<vmem>>, vector<1x128xf32>
    %cst_21 = arith.constant dense<0.000000e+00> : vector<16x128xf32>
    %25 = tpu.matmul %22, %23, %cst_21 {dimension_numbers = #tpu.dot_dimension_numbers<[1], [0], [0], [1], [0, 0, 1, 1], [], []>} : vector<16x128xbf16>, vector<128x128xbf16>, vector<16x128xf32> -> vector<16x128xf32>
    %26 = vector.broadcast %24 : vector<1x128xf32> to vector<16x128xf32>
    %27 = arith.addf %25, %26 : vector<16x128xf32>
    %c0_22 = arith.constant 0 : index
    %c0_23 = arith.constant 0 : index
    %28 = vector.load %arg10[%c0_22, %c0_23] : memref<16x128xf32, #tpu.memory_space<vmem>>, vector<16x128xf32>
    tpu.vector_store %arg10[%c0_22, %c0_23], %27 {strides = array<i32>} : memref<16x128xf32, #tpu.memory_space<vmem>>, vector<16x128xf32>,
    return
  }
  func.func @transform_0(%arg0: i32) -> (i32, i32) {
    %c0_i32 = arith.constant 0 : i32
    %c0_i32_0 = arith.constant 0 : i32
    return %arg0, %c0_i32 : i32, i32
  }
  func.func @transform_1(%arg0: i32) -> (i32, i32) {
    %c0_i32 = arith.constant 0 : i32
    %c0_i32_0 = arith.constant 0 : i32
    %c0_i32_1 = arith.constant 0 : i32
    return %c0_i32, %c0_i32_0 : i32, i32
  }
  func.func @transform_2(%arg0: i32) -> (i32, i32) {
    %c0_i32 = arith.constant 0 : i32
    %c0_i32_0 = arith.constant 0 : i32
    %c0_i32_1 = arith.constant 0 : i32
    return %c0_i32, %c0_i32_0 : i32, i32
  }
  func.func @transform_3(%arg0: i32) -> (i32, i32) {
    %c0_i32 = arith.constant 0 : i32
    %c0_i32_0 = arith.constant 0 : i32
    %c0_i32_1 = arith.constant 0 : i32
    return %c0_i32, %c0_i32_0 : i32, i32
  }
  func.func @transform_4(%arg0: i32) -> (i32, i32) {
    %c0_i32 = arith.constant 0 : i32
    %c0_i32_0 = arith.constant 0 : i32
    %c0_i32_1 = arith.constant 0 : i32
    return %c0_i32, %c0_i32_0 : i32, i32
  }
  func.func @transform_5(%arg0: i32) -> (i32, i32) {
    %c0_i32 = arith.constant 0 : i32
    %c0_i32_0 = arith.constant 0 : i32
    %c0_i32_1 = arith.constant 0 : i32
    return %c0_i32, %c0_i32_0 : i32, i32
  }
  func.func @transform_6(%arg0: i32) -> (i32, i32) {
    %c0_i32 = arith.constant 0 : i32
    %c0_i32_0 = arith.constant 0 : i32
    %c0_i32_1 = arith.constant 0 : i32
    return %c0_i32, %c0_i32_0 : i32, i32
  }
  func.func @transform_7(%arg0: i32) -> (i32, i32) {
    %c0_i32 = arith.constant 0 : i32
    %c0_i32_0 = arith.constant 0 : i32
    %c0_i32_1 = arith.constant 0 : i32
    return %c0_i32, %c0_i32_0 : i32, i32
  }
  func.func @transform_8(%arg0: i32) -> (i32, i32) {
    %c0_i32 = arith.constant 0 : i32
    %c0_i32_0 = arith.constant 0 : i32
    %c0_i32_1 = arith.constant 0 : i32
    return %c0_i32, %c0_i32_0 : i32, i32
  }
  func.func @transform_9(%arg0: i32) -> (i32, i32) {
    %c0_i32 = arith.constant 0 : i32
    %c0_i32_0 = arith.constant 0 : i32
    return %arg0, %c0_i32 : i32, i32
  }
}

</mosaic_0001>

<bundles_post_ra>
// kernel: autoencoder_forward.1
= control target key start
LH: loop header
LB: loop body
LE: loop exit
PB: predicated region body
PF: predicated region fallthrough
CT: control target
= control target key end

     0   :  { %14 = vsyncpa [#allocation3], 0  ;;  %s813_s0 = inlined_call_operand.vmem [shape: bf16[16,128], index: 0, kind: input, shape index: {}]   ;;  %s814_s1 = inlined_call_operand.hbm [shape: bf16[128,128], index: 1, kind: input, shape index: {}]   ;;  %s815_s2 = inlined_call_operand.vmem [shape: f32[1,128], index: 2, kind: input, shape index: {}]   ;;  %s816_s3 = inlined_call_operand.hbm [shape: bf16[128,128], index: 3, kind: input, shape index: {}]   ;;  %s817_s4 = inlined_call_operand.vmem [shape: f32[1,128], index: 4, kind: input, shape index: {}]   ;;  %s818_s5 = inlined_call_operand.hbm [shape: bf16[128,128], index: 5, kind: input, shape index: {}]   ;;  %s819_s6 = inlined_call_operand.vmem [shape: f32[1,128], index: 6, kind: input, shape index: {}]   ;;  %s820_s7 = inlined_call_operand.hbm [shape: bf16[128,128], index: 7, kind: input, shape index: {}]   ;;  %s821_s8 = inlined_call_operand.vmem [shape: f32[1,128], index: 8, kind: input, shape index: {}]   ;;  %s822_s9 = inlined_call_operand.vmem [shape: f32[16,128], index: 9, kind: output, shape index: {}]  }
   0x1   :  { %15 = vsyncpa [#allocation5], 0 }
   0x2   :  { %16 = vsyncpa [#allocation8], 0  ;;  %s38_s11 = sshll.u32 %s816_s3, 4  ;;  %s724_s12 = smov [#allocation4]   ;;  %s39_s11 = int_to_ptr.hbm [resolvable:$true] %s38_s11 }
   0x3   :  { %s40_s13 = sshll.u32 %s724_s12, 4  ;;  %s23_s16 = sshll.u32 %s814_s1, 4  ;;  %s41_s13 = int_to_ptr.vmem [resolvable:$true] %s40_s13  ;;  %s24_s16 = int_to_ptr.hbm [resolvable:$true] %s23_s16 }
   0x4   :  { %s725_s17 = smov 64   ;;  %s726_s18 = smov 4  }
   0x5   :  { %46 = dma.hbm_to_vmem [thread:$0]  %s39_s11, 1024, %s41_s13, [#allocation5], %s725_s17, %s725_s17, %s726_s18  }
   0x6   :  { %s727_s19 = smov [#allocation2]   ;;  %s53_s23 = sshll.u32 %s818_s5, 4  ;;  %s54_s23 = int_to_ptr.hbm [resolvable:$true] %s53_s23 }
   0x7   :  { %s25_s20 = sshll.u32 %s727_s19, 4  ;;  %s68_s25 = sshll.u32 %s820_s7, 4  ;;  %s26_s20 = int_to_ptr.vmem [resolvable:$true] %s25_s20  ;;  %s69_s25 = int_to_ptr.hbm [resolvable:$true] %s68_s25 }
   0x8   :  { %31 = dma.hbm_to_vmem [thread:$0]  %s24_s16, 1024, %s26_s20, [#allocation3], %s725_s17, %s725_s17, %s726_s18  }
   0x9   :  { %s728_s26 = smov [#allocation6]   ;;  %s729_s1 = smov [#allocation7]  }
   0xa   :  { %s55_s27 = sshll.u32 %s728_s26, 4  ;;  %s70_s28 = sshll.u32 %s729_s1, 4  ;;  %s56_s27 = int_to_ptr.vmem [resolvable:$true] %s55_s27  ;;  %s71_s28 = int_to_ptr.vmem [resolvable:$true] %s70_s28 }
   0xb   :  { %61 = dma.hbm_to_vmem [thread:$0]  %s54_s23, 1024, %s56_s27, [#allocation5], %s725_s17, %s725_s17, %s726_s18  }
   0xc   :  { %76 = dma.hbm_to_vmem [thread:$0]  %s69_s25, 1024, %s71_s28, [#allocation8], %s725_s17, %s725_s17, %s726_s18  }
   0xd   :  { %718 = dma.done.wait [#allocation3], 1024  }
   0xe   :  { %719 = vsyncadd [#allocation3], 4294966272 }
   0xf   :  { %720 = dma.done.wait [#allocation5], 2048  }
  0x10   :  { %721 = vsyncadd [#allocation5], 4294965248 }
  0x11   :  { %722 = dma.done.wait [#allocation8], 1024  }
  0x12   :  { %723 = vsyncadd [#allocation8], 4294966272  ;;  %v587_v0 = vld [vmem:[#allocation2 + $0x38] sm:$0xff]  ;;  %v586_v1 = vld [vmem:[#allocation2 + $0x30] sm:$0xff] }
  0x13   :  { %171 = vmatpush.bf16.msra.mxu0 %v587_v0  ;;  %v595_v2 = vld [vmem:[#allocation4 + $0x38] sm:$0xff]  ;;  %v594_v3 = vld [vmem:[#allocation4 + $0x30] sm:$0xff]  ;;  %v585_v4 = vld [vmem:[#allocation2 + $0x28] sm:$0xff] }
  0x14   :  { %256 = vmatpush.bf16.msra.mxu1 %v595_v2  ;;  %v593_v5 = vld [vmem:[#allocation4 + $0x28] sm:$0xff]  ;;  %v584_v6 = vld [vmem:[#allocation2 + $0x20] sm:$0xff]  ;;  %v583_v8 = vld [vmem:[#allocation2 + $0x18] sm:$0xff] }
  0x15   :  { %v592_v7 = vld [vmem:[#allocation4 + $0x20] sm:$0xff]  ;;  %v582_v9 = vld [vmem:[#allocation2 + $0x10] sm:$0xff]  ;;  %v581_v10 = vld [vmem:[#allocation2 + $0x8] sm:$0xff] }
  0x16   :  { %v580_v11 = vld [vmem:[#allocation2] sm:$0xff]  ;;  %v591_v13 = vld [vmem:[#allocation4 + $0x18] sm:$0xff]  ;;  %v590_v14 = vld [vmem:[#allocation4 + $0x10] sm:$0xff] }
  0x17   :  { %172 = vmatpush.bf16.msra.mxu0 %v586_v1  ;;  %v579_v12 = vld [vmem:[%s813_s0] sm:$0xff]  ;;  %v589_v15 = vld [vmem:[#allocation4 + $0x8] sm:$0xff]  ;;  %v603_v17 = vld [vmem:[#allocation6 + $0x38] sm:$0xff] }
  0x18   :  { %257 = vmatpush.bf16.msra.mxu1 %v594_v3  ;;  %v588_v16 = vld [vmem:[#allocation4] sm:$0xff]  ;;  %339 = vmatpush.bf16.msra.mxu2 %v603_v17  ;;  %v602_v18 = vld [vmem:[#allocation6 + $0x30] sm:$0xff]  ;;  %v601_v19 = vld [vmem:[#allocation6 + $0x28] sm:$0xff] }
  0x19   :  { %v600_v20 = vld [vmem:[#allocation6 + $0x20] sm:$0xff]  ;;  %v599_v21 = vld [vmem:[#allocation6 + $0x18] sm:$0xff]  ;;  %v598_v30 = vld [vmem:[#allocation6 + $0x10] sm:$0xff] }
  0x1a   :  { %v618_v23 = vld [vmem:[%s815_s2] ss:$0 sm:$0xff]  ;;  %v597_v31 = vld [vmem:[#allocation6 + $0x8] sm:$0xff]  ;;  %v611_v33 = vld [vmem:[#allocation7 + $0x38] sm:$0xff] }
  0x1b   :  { %173 = vmatpush.bf16.msra.mxu0 %v585_v4  ;;  %v596_v32 = vld [vmem:[#allocation6] sm:$0xff]  ;;  %424 = vmatpush.bf16.msra.mxu3 %v611_v33  ;;  %v610_v34 = vld [vmem:[#allocation7 + $0x30] sm:$0xff]  ;;  %v609_v35 = vld [vmem:[#allocation7 + $0x28] sm:$0xff] }
  0x1c   :  { %258 = vmatpush.bf16.msra.mxu1 %v593_v5  ;;  %340 = vmatpush.bf16.msra.mxu2 %v602_v18  ;;  %v608_v36 = vld [vmem:[#allocation7 + $0x20] sm:$0xff]  ;;  %v607_v43 = vld [vmem:[#allocation7 + $0x18] sm:$0xff]  ;;  %v606_v44 = vld [vmem:[#allocation7 + $0x10] sm:$0xff] }
  0x1d   :  { %v619_v38 = vld [vmem:[%s817_s4] ss:$0 sm:$0xff]  ;;  %v605_v45 = vld [vmem:[#allocation7 + $0x8] sm:$0xff] }
  0x1e   :  { %v604_v46 = vld [vmem:[#allocation7] sm:$0xff] }
  0x1f   :  { %174 = vmatpush.bf16.msra.mxu0 %v584_v6  ;;  %425 = vmatpush.bf16.msra.mxu3 %v610_v34  ;;  %v620_v48 = vld [vmem:[%s819_s6] ss:$0 sm:$0xff] }
  0x20   :  { %259 = vmatpush.bf16.msra.mxu1 %v592_v7  ;;  %341 = vmatpush.bf16.msra.mxu2 %v601_v19  ;;  %v621_v55 = vld [vmem:[%s821_s8] ss:$0 sm:$0xff] }
  0x23   :  { %175 = vmatpush.bf16.msra.mxu0 %v583_v8  ;;  %426 = vmatpush.bf16.msra.mxu3 %v609_v35 }
  0x24   :  { %260 = vmatpush.bf16.msra.mxu1 %v591_v13  ;;  %342 = vmatpush.bf16.msra.mxu2 %v600_v20 }
  0x27   :  { %176 = vmatpush.bf16.msra.mxu0 %v582_v9  ;;  %427 = vmatpush.bf16.msra.mxu3 %v608_v36 }
  0x28   :  { %261 = vmatpush.bf16.msra.mxu1 %v590_v14  ;;  %343 = vmatpush.bf16.msra.mxu2 %v599_v21 }
  0x2b   :  { %177 = vmatpush.bf16.msra.mxu0 %v581_v10  ;;  %428 = vmatpush.bf16.msra.mxu3 %v607_v43 }
  0x2c   :  { %262 = vmatpush.bf16.msra.mxu1 %v589_v15  ;;  %344 = vmatpush.bf16.msra.mxu2 %v598_v30 }
  0x2f   :  { %178 = vmatpush.bf16.msra.mxu0 %v580_v11  ;;  %429 = vmatpush.bf16.msra.mxu3 %v606_v44 }
  0x30   :  { %263 = vmatpush.bf16.msra.mxu1 %v588_v16  ;;  %345 = vmatpush.bf16.msra.mxu2 %v597_v31 }
  0x32   :  { %179 = vmatmul.bf16.vlgmr.msra.gmra.mxu0 %v579_v12 }
  0x33   :  { %430 = vmatpush.bf16.msra.mxu3 %v605_v45 }
  0x34   :  { %346 = vmatpush.bf16.msra.mxu2 %v596_v32 }
  0x37   :  { %431 = vmatpush.bf16.msra.mxu3 %v604_v46 }
  0xaf   :  { %v180_v22 = vpop.f32.mrf.mxu0 }
  0xb0   :  { %v181_v24 = vadd.f32 %v618_v23, %v180_v22 }
  0xb2   :  { %v185_v27 = vmax.f32 %v181_v24, 0.0 }
  0xb7   :  { %v182_v25 = vpop.f32.mrf.mxu0 }
  0xb8   :  { %v183_v26 = vadd.f32 %v618_v23, %v182_v25 }
  0xba   :  { %v186_v28 = vmax.f32 %v183_v26, 0.0 }
  0xbc   :  { %v187_v29 = vpack.c.bf16 %v186_v28, %v185_v27 }
  0xbe   :  { %264 = vmatmul.bf16.vlgmr.msra.gmra.mxu1 %v187_v29 }
 0x13b   :  { %v265_v37 = vpop.f32.mrf.mxu1 }
 0x13c   :  { %v266_v40 = vadd.f32 %v619_v38, %v265_v37 }
 0x143   :  { %v267_v39 = vpop.f32.mrf.mxu1 }
 0x144   :  { %v268_v41 = vadd.f32 %v619_v38, %v267_v39 }
 0x146   :  { %v270_v42 = vpack.c.bf16 %v268_v41, %v266_v40 }
 0x148   :  { %347 = vmatmul.bf16.vlgmr.msra.gmra.mxu2 %v270_v42 }
 0x1cb   :  { %v348_v47 = vpop.f32.mrf.mxu2 }
 0x1cc   :  { %v349_v49 = vadd.f32 %v620_v48, %v348_v47 }
 0x1ce   :  { %v353_v52 = vmax.f32 %v349_v49, 0.0 }
 0x1d3   :  { %v350_v50 = vpop.f32.mrf.mxu2 }
 0x1d4   :  { %v351_v51 = vadd.f32 %v620_v48, %v350_v50 }
 0x1d6   :  { %v354_v53 = vmax.f32 %v351_v51, 0.0 }
 0x1d8   :  { %v355_v54 = vpack.c.bf16 %v354_v53, %v353_v52 }
 0x1da   :  { %432 = vmatmul.bf16.vlgmr.msra.gmra.mxu3 %v355_v54 }
 0x25d   :  { %v433_v56 = vpop.f32.mrf.mxu3 }
 0x25e   :  { %v434_v57 = vadd.f32 %v621_v55, %v433_v56 }
 0x260   :  { %438 = vst [vmem:[%s822_s9] sm:$0xff] %v434_v57 }
 0x265   :  { %v435_v58 = vpop.f32.mrf.mxu3 }
 0x266   :  { %v436_v59 = vadd.f32 %v621_v55, %v435_v58 }
 0x268   :  { %439 = vst [vmem:[%s822_s9 + $0x8] sm:$0xff] %v436_v59 }
 0x269   :  { %444 = vsyncpa [#allocation3], 1 }
 0x26a   :  { %445 = vsyncpa [#allocation5], 1 }
 0x26b   :  { %446 = vsyncpa [#allocation8], 1 }

</bundles_post_ra>
